<compile_context>
chip_gen: v7x
topology: tpu7x:2x2x1
jax: 0.10.0
libtpu: 0.0.40
codegen_flags: <defaults>
</compile_context>

<pallas_src>
import functools

import jax
import jax.numpy as jnp
from jax.experimental import pallas as pl
from jax.experimental.pallas import tpu as pltpu

LN_EPS = 1e-5          # nn.LayerNorm default eps
NEG_INF = -1e9         # matches masked_fill(masks == 0, -1000000000.0)


def _round_up(n, m):
    return ((n + m - 1) // m) * m


def _pick_batch_tile(B, S, D, A, itemsize, batch_tile):
    """Pick a batch tile that fits a conservative VMEM budget."""
    # Rough per-batch-row VMEM footprint (bytes): double-buffered native x
    # tile, in-kernel f32 + bf16 copies of x, f32 tanh activations, small
    # softmax temporaries and the weights output buffer.
    per_row = S * (2 * D * itemsize + 6 * D + 8 * A + 32) + 8 * D
    budget = 32 * 1024 * 1024
    bt = min(batch_tile, max(1, budget // max(per_row, 1)))
    # Keep at least 2 grid steps when B allows it so v7x's two TensorCores
    # both get work under dimension_semantics=("parallel",).
    bt = min(bt, _round_up(max(1, (B + 1) // 2), 8))
    bt = max(8, (bt // 8) * 8)   # sublane-aligned for the 2-D output blocks
    return bt


def hier_attn_kernel(x_ref, m_ref, w1_ref, b1_ref, w2_ref, g_ref, b_ref,
                     ctx_ref, wts_ref):
    """One batch tile of hierarchical attention.

    x_ref  : (TB, S, D)  sequence features, native dtype
    m_ref  : (TB, S)     1.0 = keep, 0.0 = masked
    w1_ref : (D, A)      first attention Linear weight (pre-transposed, bf16)
    b1_ref : (1, A)      first attention Linear bias (f32)
    w2_ref : (1, A)      second attention Linear weight, bias-free (f32)
    g_ref  : (1, D)      LayerNorm gamma (f32)
    b_ref  : (1, D)      LayerNorm beta  (f32)
    ctx_ref: (TB, D)     attended + normalized context        (output)
    wts_ref: (TB, S_out) softmax attention weights, lane-dense (output)
    """
    tb, s, d = x_ref.shape
    a = w1_ref.shape[1]

    # f32 copy of the tile for the pooling / LayerNorm precision path.
    xf = x_ref[...].astype(jnp.float32)                          # (TB, S, D)

    # --- attention scores: tanh(x @ W1 + b1) . w2  (bf16 MXU, f32 acc) ----
    xb = x_ref[...].astype(jnp.bfloat16).reshape(tb * s, d)
    h = jnp.tanh(
        jnp.dot(xb, w1_ref[...], preferred_element_type=jnp.float32)
        + b1_ref[...])                                           # (TB*S, A) f32
    # Lane-reduce over A; the result lands with the sequence axis on lanes.
    scores = jnp.sum(h.reshape(tb, s, a) * w2_ref[...], axis=-1)  # (TB, S)

    # --- masked softmax over the sequence (lane) axis ----------------------
    scores = jnp.where(m_ref[...] == 0.0, NEG_INF, scores)
    smax = jnp.max(scores, axis=-1, keepdims=True)               # (TB, 1)
    p = jnp.exp(scores - smax)
    denom = jnp.sum(p, axis=-1, keepdims=True)
    wts = p * pl.reciprocal(denom, approx=True)                  # (TB, S)
    # Dropout on the attention weights == identity in eval mode.
    # TODO(synk): training-mode dropout (pltpu.prng_random_bits mask) not included.

    # --- attention pooling: ctx[b, :] = sum_s wts[b, s] * x[b, s, :] -------
    ctx = jax.lax.dot_general(
        wts[:, None, :], xf,
        dimension_numbers=(((2,), (1,)), ((0,), (0,))),
        preferred_element_type=jnp.float32)[:, 0, :]             # (TB, D)

    # --- LayerNorm over the full (unpadded) feature width ------------------
    mu = jnp.mean(ctx, axis=-1, keepdims=True)
    diff = ctx - mu
    var = jnp.mean(diff * diff, axis=-1, keepdims=True)
    out = diff * jax.lax.rsqrt(var + LN_EPS) * g_ref[...] + b_ref[...]
    ctx_ref[...] = out.astype(ctx_ref.dtype)

    # --- lane-dense weights store (zero-fill any padded tail) --------------
    if wts_ref.shape[1] == s:
        wts_ref[...] = wts.astype(wts_ref.dtype)
    else:
        wts_ref[...] = jnp.zeros(wts_ref.shape, wts_ref.dtype)
        wts_ref[:, :s] = wts.astype(wts_ref.dtype)


@functools.partial(jax.jit, static_argnames=("batch_tile",))
def hierarchical_attention(x, task_ids, params, masks=None, batch_tile=64):
    """x: (B, S, D), task_ids: (B, 1) [unused, kept for parity], masks: (B, S).

    Returns (task_context (B, D), stroke_weights (B, S)), both in x.dtype
    (intentionally matching the module/parameter dtype).
    """
    del task_ids  # unused by the PyTorch forward as well
    w1, b1, w2, gamma, beta = params
    B, S, D = x.shape
    A = w1.shape[1]
    if masks is None:
        masks = jnp.ones((B, S), jnp.float32)

    bt = _pick_batch_tile(B, S, D, A, x.dtype.itemsize, batch_tile)
    B_pad = _round_up(B, bt)
    S_out = _round_up(S, 128)       # lane-dense attention-weights output

    # Only the batch axis is padded; x keeps its native dtype, padded rows are
    # zero (numerically inert, sliced off at the end).
    xp = x if B_pad == B else jnp.zeros((B_pad, S, D), x.dtype).at[:B].set(x)
    mf = masks.astype(jnp.float32)
    mp = mf if B_pad == B else jnp.ones((B_pad, S), jnp.float32).at[:B].set(mf)

    w1b = w1.astype(jnp.bfloat16)                    # bf16 MXU operand
    b1r = b1.astype(jnp.float32).reshape(1, A)
    w2r = w2.astype(jnp.float32).reshape(1, A)
    gr = gamma.astype(jnp.float32).reshape(1, D)
    br = beta.astype(jnp.float32).reshape(1, D)

    grid = (B_pad // bt,)
    ctx_p, wts_p = pl.pallas_call(
        hier_attn_kernel,
        out_shape=(jax.ShapeDtypeStruct((B_pad, D), x.dtype),
                   jax.ShapeDtypeStruct((B_pad, S_out), x.dtype)),
        grid_spec=pltpu.PrefetchScalarGridSpec(
            num_scalar_prefetch=0,
            grid=grid,
            in_specs=[
                pl.BlockSpec((bt, S, D), lambda i: (i, 0, 0)),   # x (native)
                pl.BlockSpec((bt, S), lambda i: (i, 0)),         # mask
                # Constant index_maps: fetched once by the pipeline.
                pl.BlockSpec((D, A), lambda i: (0, 0)),          # W1 (bf16)
                pl.BlockSpec((1, A), lambda i: (0, 0)),          # b1
                pl.BlockSpec((1, A), lambda i: (0, 0)),          # w2
                pl.BlockSpec((1, D), lambda i: (0, 0)),          # gamma
                pl.BlockSpec((1, D), lambda i: (0, 0)),          # beta
            ],
            out_specs=(
                pl.BlockSpec((bt, D), lambda i: (i, 0)),         # context
                pl.BlockSpec((bt, S_out), lambda i: (i, 0)),     # weights
            ),
        ),
        compiler_params=pltpu.CompilerParams(
            dimension_semantics=("parallel",),
            # Well under v7x's 64 MiB physical VMEM; raise toward ~100 MiB on
            # v5e/v6e (128 MiB) together with `batch_tile` for bigger tiles.
            vmem_limit_bytes=48 * 1024 * 1024),
    )(xp, mp, w1b, b1r, w2r, gr, br)

    task_context = ctx_p[:B]
    stroke_weights = wts_p[:B, :S]
    return task_context, stroke_weights


def init_params(key, input_dim, attention_dim, dtype=jnp.float32):
    """Shapes matching the PyTorch module (stroke-attention branch + LayerNorm).

    nn.Linear stores weight as (out, in); W1 is kept pre-transposed as
    (input_dim, attention_dim) so the kernel computes x @ W1.
    """
    k1, k2, k3 = jax.random.split(key, 3)
    bound1 = 1.0 / (input_dim ** 0.5)
    w1 = jax.random.uniform(k1, (input_dim, attention_dim), dtype, -bound1, bound1)
    b1 = jax.random.uniform(k2, (attention_dim,), dtype, -bound1, bound1)
    bound2 = 1.0 / (attention_dim ** 0.5)
    w2 = jax.random.uniform(k3, (attention_dim,), dtype, -bound2, bound2)
    gamma = jnp.ones((input_dim,), dtype)
    beta = jnp.zeros((input_dim,), dtype)
    return (w1, b1, w2, gamma, beta)


def reference(x, params, masks):
    """Plain-JAX reference mirroring the PyTorch forward (eval mode, f32)."""
    w1, b1, w2, gamma, beta = params
    h = jnp.tanh(x @ w1 + b1)                       # (B, S, A)
    scores = h @ w2                                 # (B, S)
    scores = jnp.where(masks == 0, NEG_INF, scores)
    wts = jax.nn.softmax(scores, axis=1)
    ctx = jnp.einsum('bs,bsd->bd', wts, x)          # (B, D)
    mu = jnp.mean(ctx, -1, keepdims=True)
    var = jnp.mean((ctx - mu) ** 2, -1, keepdims=True)
    ctxn = (ctx - mu) / jnp.sqrt(var + LN_EPS) * gamma + beta
    return ctxn, wts


if __name__ == "__main__":
    B, S, INPUT_DIM, ATTENTION_DIM = 2, 8, 16, 64

    key = jax.random.PRNGKey(0)
    k_x, k_p = jax.random.split(key)
    x = jax.random.normal(k_x, (B, S, INPUT_DIM), jnp.float32)
    task_ids = jnp.zeros((B, 1), jnp.int32)
    # Mask out the last two positions of the second sequence.
    masks = jnp.ones((B, S), jnp.float32).at[1, S - 2:].set(0.0)
    params = init_params(k_p, INPUT_DIM, ATTENTION_DIM)

    ctx, wts = hierarchical_attention(x, task_ids, params, masks)
    ctx = jax.block_until_ready(ctx)
    wts = jax.block_until_ready(wts)

    ref_ctx, ref_wts = reference(x, params, masks)
    assert ctx.shape == (B, INPUT_DIM)
    assert wts.shape == (B, S)
    # The kernel uses bf16 MXU operands for the score matmul (f32 accumulate)
    # and an approx EUP reciprocal, so compare against the f32 reference with
    # correspondingly relaxed tolerances.
    assert jnp.allclose(ctx, ref_ctx, atol=1e-2, rtol=1e-2), "context mismatch"
    assert jnp.allclose(wts, ref_wts, atol=2e-3, rtol=2e-2), "weights mismatch"

    print("KERNEL_OK")
</pallas_src>

<mosaic_0001>
module attributes {stable_mosaic.version = 11 : i64} {
  func.func @hier_attn_kernel(%arg0: i32, %arg1: memref<8x8x16xf32, #tpu.memory_space<vmem>>, %arg2: memref<8x8xf32, #tpu.memory_space<vmem>>, %arg3: memref<16x64xbf16, #tpu.memory_space<vmem>>, %arg4: memref<1x64xf32, #tpu.memory_space<vmem>>, %arg5: memref<1x64xf32, #tpu.memory_space<vmem>>, %arg6: memref<1x16xf32, #tpu.memory_space<vmem>>, %arg7: memref<1x16xf32, #tpu.memory_space<vmem>>, %arg8: memref<8x16xf32, #tpu.memory_space<vmem>>, %arg9: memref<8x128xf32, #tpu.memory_space<vmem>>) attributes {dimension_semantics = [#tpu.dimension_semantics<parallel>], iteration_bounds = array<i64: 1>, scalar_prefetch = 0 : i64, scratch_operands = 0 : i64, tpu.core_type = #tpu.core_type<tc>, window_params = [{transform_indices = @transform_0, window_bounds = array<i64: 8, 8, 16>}, {transform_indices = @transform_1, window_bounds = array<i64: 8, 8>}, {pipeline_mode = #tpu.pipeline_mode<synchronous>, transform_indices = @transform_2, window_bounds = array<i64: 16, 64>}, {pipeline_mode = #tpu.pipeline_mode<synchronous>, transform_indices = @transform_3, window_bounds = array<i64: 1, 64>}, {pipeline_mode = #tpu.pipeline_mode<synchronous>, transform_indices = @transform_4, window_bounds = array<i64: 1, 64>}, {pipeline_mode = #tpu.pipeline_mode<synchronous>, transform_indices = @transform_5, window_bounds = array<i64: 1, 16>}, {pipeline_mode = #tpu.pipeline_mode<synchronous>, transform_indices = @transform_6, window_bounds = array<i64: 1, 16>}, {transform_indices = @transform_7, window_bounds = array<i64: 8, 16>}, {transform_indices = @transform_8, window_bounds = array<i64: 8, 128>}]} {
    %c0 = arith.constant 0 : index
    %c0_0 = arith.constant 0 : index
    %c0_1 = arith.constant 0 : index
    %0 = vector.load %arg1[%c0, %c0_0, %c0_1] : memref<8x8x16xf32, #tpu.memory_space<vmem>>, vector<8x8x16xf32>
    %c0_2 = arith.constant 0 : index
    %c0_3 = arith.constant 0 : index
    %c0_4 = arith.constant 0 : index
    %1 = vector.load %arg1[%c0_2, %c0_3, %c0_4] : memref<8x8x16xf32, #tpu.memory_space<vmem>>, vector<8x8x16xf32>
    %2 = arith.truncf %1 : vector<8x8x16xf32> to vector<8x8x16xbf16>
    %3 = vector.shape_cast %2 : vector<8x8x16xbf16> to vector<64x16xbf16>
    %c0_5 = arith.constant 0 : index
    %c0_6 = arith.constant 0 : index
    %4 = vector.load %arg3[%c0_5, %c0_6] : memref<16x64xbf16, #tpu.memory_space<vmem>>, vector<16x64xbf16>
    %cst = arith.constant dense<0.000000e+00> : vector<64x64xf32>
    %5 = tpu.matmul %3, %4, %cst {dimension_numbers = #tpu.dot_dimension_numbers<[1], [0], [0], [1], [0, 0, 1, 1], [], []>} : vector<64x16xbf16>, vector<16x64xbf16>, vector<64x64xf32> -> vector<64x64xf32>
    %c0_7 = arith.constant 0 : index
    %c0_8 = arith.constant 0 : index
    %6 = vector.load %arg4[%c0_7, %c0_8] : memref<1x64xf32, #tpu.memory_space<vmem>>, vector<1x64xf32>
    %7 = vector.broadcast %6 : vector<1x64xf32> to vector<64x64xf32>
    %8 = arith.addf %5, %7 : vector<64x64xf32>
    %9 = math.tanh %8 : vector<64x64xf32>
    %10 = vector.shape_cast %9 : vector<64x64xf32> to vector<8x8x64xf32>
    %c0_9 = arith.constant 0 : index
    %c0_10 = arith.constant 0 : index
    %11 = vector.load %arg5[%c0_9, %c0_10] : memref<1x64xf32, #tpu.memory_space<vmem>>, vector<1x64xf32>
    %12 = vector.shape_cast %11 : vector<1x64xf32> to vector<1x1x64xf32>
    %13 = vector.broadcast %12 : vector<1x1x64xf32> to vector<8x8x64xf32>
    %14 = arith.mulf %10, %13 : vector<8x8x64xf32>
    %cst_11 = arith.constant dense<0.000000e+00> : vector<8x8xf32>
    %15 = vector.multi_reduction <add>, %14, %cst_11 [2] : vector<8x8x64xf32> to vector<8x8xf32>
    %c0_12 = arith.constant 0 : index
    %c0_13 = arith.constant 0 : index
    %16 = vector.load %arg2[%c0_12, %c0_13] : memref<8x8xf32, #tpu.memory_space<vmem>>, vector<8x8xf32>
    %cst_14 = arith.constant 0.000000e+00 : f32
    %17 = vector.broadcast %cst_14 : f32 to vector<8x8xf32>
    %18 = arith.cmpf oeq, %16, %17 : vector<8x8xf32>
    %cst_15 = arith.constant -1.000000e+09 : f32
    %19 = vector.broadcast %cst_15 : f32 to vector<8x8xf32>
    %20 = arith.select %18, %19, %15 : vector<8x8xi1>, vector<8x8xf32>
    %cst_16 = arith.constant dense<0xFF800000> : vector<8xf32>
    %21 = vector.multi_reduction <maximumf>, %20, %cst_16 [1] : vector<8x8xf32> to vector<8xf32>
    %22 = vector.shape_cast %21 : vector<8xf32> to vector<8x1xf32>
    %23 = vector.broadcast %22 : vector<8x1xf32> to vector<8x8xf32>
    %24 = arith.subf %20, %23 : vector<8x8xf32>
    %25 = math.exp %24 : vector<8x8xf32>
    %cst_17 = arith.constant dense<0.000000e+00> : vector<8xf32>
    %26 = vector.multi_reduction <add>, %25, %cst_17 [1] : vector<8x8xf32> to vector<8xf32>
    %27 = vector.shape_cast %26 : vector<8xf32> to vector<8x1xf32>
    %28 = tpu.reciprocal %27 {approx = true} : vector<8x1xf32> -> vector<8x1xf32>
    %29 = vector.broadcast %28 : vector<8x1xf32> to vector<8x8xf32>
    %30 = arith.mulf %25, %29 : vector<8x8xf32>
    %31 = vector.shape_cast %30 : vector<8x8xf32> to vector<8x1x8xf32>
    %cst_18 = arith.constant dense<0.000000e+00> : vector<8x1x16xf32>
    %32 = tpu.matmul %31, %0, %cst_18 {dimension_numbers = #tpu.dot_dimension_numbers<[2], [1], [1], [2], [0, 0, 0, 1, 1, 2], [0], [0]>} : vector<8x1x8xf32>, vector<8x8x16xf32>, vector<8x1x16xf32> -> vector<8x1x16xf32>
    %33 = vector.shape_cast %32 : vector<8x1x16xf32> to vector<8x16xf32>
    %cst_19 = arith.constant dense<0.000000e+00> : vector<8xf32>
    %34 = vector.multi_reduction <add>, %33, %cst_19 [1] : vector<8x16xf32> to vector<8xf32>
    %35 = vector.shape_cast %34 : vector<8xf32> to vector<8x1xf32>
    %cst_20 = arith.constant 1.600000e+01 : f32
    %36 = vector.broadcast %cst_20 : f32 to vector<8x1xf32>
    %37 = arith.divf %35, %36 : vector<8x1xf32>
    %38 = vector.broadcast %37 : vector<8x1xf32> to vector<8x16xf32>
    %39 = arith.subf %33, %38 : vector<8x16xf32>
    %40 = arith.mulf %39, %39 : vector<8x16xf32>
    %cst_21 = arith.constant dense<0.000000e+00> : vector<8xf32>
    %41 = vector.multi_reduction <add>, %40, %cst_21 [1] : vector<8x16xf32> to vector<8xf32>
    %42 = vector.shape_cast %41 : vector<8xf32> to vector<8x1xf32>
    %cst_22 = arith.constant 1.600000e+01 : f32
    %43 = vector.broadcast %cst_22 : f32 to vector<8x1xf32>
    %44 = arith.divf %42, %43 : vector<8x1xf32>
    %cst_23 = arith.constant 9.99999974E-6 : f32
    %45 = vector.broadcast %cst_23 : f32 to vector<8x1xf32>
    %46 = arith.addf %44, %45 : vector<8x1xf32>
    %47 = math.rsqrt %46 : vector<8x1xf32>
    %48 = vector.broadcast %47 : vector<8x1xf32> to vector<8x16xf32>
    %49 = arith.mulf %39, %48 : vector<8x16xf32>
    %c0_24 = arith.constant 0 : index
    %c0_25 = arith.constant 0 : index
    %50 = vector.load %arg6[%c0_24, %c0_25] : memref<1x16xf32, #tpu.memory_space<vmem>>, vector<1x16xf32>
    %51 = vector.broadcast %50 : vector<1x16xf32> to vector<8x16xf32>
    %52 = arith.mulf %49, %51 : vector<8x16xf32>
    %c0_26 = arith.constant 0 : index
    %c0_27 = arith.constant 0 : index
    %53 = vector.load %arg7[%c0_26, %c0_27] : memref<1x16xf32, #tpu.memory_space<vmem>>, vector<1x16xf32>
    %54 = vector.broadcast %53 : vector<1x16xf32> to vector<8x16xf32>
    %55 = arith.addf %52, %54 : vector<8x16xf32>
    %c0_28 = arith.constant 0 : index
    %c0_29 = arith.constant 0 : index
    %56 = vector.load %arg8[%c0_28, %c0_29] : memref<8x16xf32, #tpu.memory_space<vmem>>, vector<8x16xf32>
    tpu.vector_store %arg8[%c0_28, %c0_29], %55 {strides = array<i32>} : memref<8x16xf32, #tpu.memory_space<vmem>>, vector<8x16xf32>,
    %cst_30 = arith.constant 0.000000e+00 : f32
    %57 = vector.broadcast %cst_30 : f32 to vector<8x128xf32>
    %c0_31 = arith.constant 0 : index
    %c0_32 = arith.constant 0 : index
    %58 = vector.load %arg9[%c0_31, %c0_32] : memref<8x128xf32, #tpu.memory_space<vmem>>, vector<8x128xf32>
    tpu.vector_store %arg9[%c0_31, %c0_32], %57 {strides = array<i32>} : memref<8x128xf32, #tpu.memory_space<vmem>>, vector<8x128xf32>,
    %c0_33 = arith.constant 0 : index
    %c0_34 = arith.constant 0 : index
    %59 = vector.load %arg9[%c0_33, %c0_34] : memref<8x128xf32, #tpu.memory_space<vmem>>, vector<8x8xf32>
    tpu.vector_store %arg9[%c0_33, %c0_34], %30 {strides = array<i32>} : memref<8x128xf32, #tpu.memory_space<vmem>>, vector<8x8xf32>,
    return
  }
  func.func @transform_0(%arg0: i32) -> (i32, i32, i32) {
    %c0_i32 = arith.constant 0 : i32
    %c0_i32_0 = arith.constant 0 : i32
    %c0_i32_1 = arith.constant 0 : i32
    return %arg0, %c0_i32, %c0_i32_0 : i32, i32, i32
  }
  func.func @transform_1(%arg0: i32) -> (i32, i32) {
    %c0_i32 = arith.constant 0 : i32
    %c0_i32_0 = arith.constant 0 : i32
    return %arg0, %c0_i32 : i32, i32
  }
  func.func @transform_2(%arg0: i32) -> (i32, i32) {
    %c0_i32 = arith.constant 0 : i32
    %c0_i32_0 = arith.constant 0 : i32
    %c0_i32_1 = arith.constant 0 : i32
    return %c0_i32, %c0_i32_0 : i32, i32
  }
  func.func @transform_3(%arg0: i32) -> (i32, i32) {
    %c0_i32 = arith.constant 0 : i32
    %c0_i32_0 = arith.constant 0 : i32
    %c0_i32_1 = arith.constant 0 : i32
    return %c0_i32, %c0_i32_0 : i32, i32
  }
  func.func @transform_4(%arg0: i32) -> (i32, i32) {
    %c0_i32 = arith.constant 0 : i32
    %c0_i32_0 = arith.constant 0 : i32
    %c0_i32_1 = arith.constant 0 : i32
    return %c0_i32, %c0_i32_0 : i32, i32
  }
  func.func @transform_5(%arg0: i32) -> (i32, i32) {
    %c0_i32 = arith.constant 0 : i32
    %c0_i32_0 = arith.constant 0 : i32
    %c0_i32_1 = arith.constant 0 : i32
    return %c0_i32, %c0_i32_0 : i32, i32
  }
  func.func @transform_6(%arg0: i32) -> (i32, i32) {
    %c0_i32 = arith.constant 0 : i32
    %c0_i32_0 = arith.constant 0 : i32
    %c0_i32_1 = arith.constant 0 : i32
    return %c0_i32, %c0_i32_0 : i32, i32
  }
  func.func @transform_7(%arg0: i32) -> (i32, i32) {
    %c0_i32 = arith.constant 0 : i32
    %c0_i32_0 = arith.constant 0 : i32
    return %arg0, %c0_i32 : i32, i32
  }
  func.func @transform_8(%arg0: i32) -> (i32, i32) {
    %c0_i32 = arith.constant 0 : i32
    %c0_i32_0 = arith.constant 0 : i32
    return %arg0, %c0_i32 : i32, i32
  }
}

</mosaic_0001>

<bundles_post_ra>
// kernel: hierarchical_attention.1
= control target key start
LH: loop header
LB: loop body
LE: loop exit
PB: predicated region body
PF: predicated region fallthrough
CT: control target
= control target key end

     0   :  { %vm80_vm0 = vcmask 130048   ;;  %vm181_vm1 = vcmask 523264   ;;  %v216_v55 = vlaneseq  ;;  %vm250_vm2 = vcmask 1041409   ;;  %s1400_s2 = inlined_call_operand.vmem [shape: bf16[16,64], index: 2, kind: input, shape index: {}]   ;;  %s1401_s0 = inlined_call_operand.vmem [shape: f32[8,8,16], index: 0, kind: input, shape index: {}]   ;;  %s1402_s3 = inlined_call_operand.vmem [shape: f32[1,64], index: 3, kind: input, shape index: {}]   ;;  %s1403_s4 = inlined_call_operand.vmem [shape: f32[1,64], index: 4, kind: input, shape index: {}]   ;;  %s1404_s1 = inlined_call_operand.vmem [shape: f32[8,8], index: 1, kind: input, shape index: {}]   ;;  %s1405_s8 = inlined_call_operand.vmem [shape: f32[8,128], index: 8, kind: output, shape index: {1}]   ;;  %s1406_s5 = inlined_call_operand.vmem [shape: f32[1,16], index: 5, kind: input, shape index: {}]   ;;  %s1407_s6 = inlined_call_operand.vmem [shape: f32[1,16], index: 6, kind: input, shape index: {}]   ;;  %s1408_s7 = inlined_call_operand.vmem [shape: f32[8,16], index: 7, kind: output, shape index: {0}]  }
   0x1   :  { %v1180_v0 = vld [vmem:[%s1400_s2] sm:$0xff]   ;;  %v1262_v2 = vld [vmem:[%s1401_s0 + $0x8] sm:$0xff]  ;;  %v1267_v3 = vld [vmem:[%s1401_s0 + $0x10] sm:$0xff]  ;;  %vm252_vm3 = vcmask 1042434   ;;  %vm254_vm4 = vcmask 1043459   ;;  %vm256_vm5 = vcmask 1044484  }
   0x2   :  { %v1257_v1 = vld [vmem:[%s1401_s0] sm:$0xff]  ;;  %1127 = vmatprep.subr.bf16.mxu0 %v1180_v0  ;;  %v1274_v5 = vld [vmem:[%s1401_s0 + $0x18] sm:$0xff]  ;;  %v1284_v7 = vld [vmem:[%s1401_s0 + $0x28] sm:$0xff]  ;;  %v217_v56 = vand.u32 127, %v216_v55  ;;  %v1320_v57 = vshrl.u32 %v216_v55, 7  ;;  %vm258_vm6 = vcmask 1045509  }
   0x3   :  { %v1102_v4 = vpack.c.bf16 %v1262_v2, %v1257_v1  ;;  %v1279_v6 = vld [vmem:[%s1401_s0 + $0x20] sm:$0xff]  ;;  %1128 = vmatpush3.bf16.msra.mxu0 %v1180_v0  ;;  %v1103_v8 = vpack.c.bf16 %v1274_v5, %v1267_v3  ;;  %v1296_v10 = vld [vmem:[%s1401_s0 + $0x30] sm:$0xff]  ;;  %v1301_v11 = vld [vmem:[%s1401_s0 + $0x38] sm:$0xff]  ;;  %vm260_vm7 = vcmask 1046534   ;;  %vm262_vm8 = vcmask 1047559  }
   0x4   :  { %v1104_v9 = vpack.c.bf16 %v1284_v7, %v1279_v6  ;;  %v1105_v12 = vpack.c.bf16 %v1301_v11, %v1296_v10  ;;  %v1081_v13 = vld [vmem:[%s1402_s3] ss:$0 sm:$0xff]  ;;  %v220_v60 = vsub.s32 %v217_v56, %v1320_v57  ;;  %vm266_vm10 = vcmask 64512  }
   0x5   :  { %1129 = vmatprep.mubr.msk.bf16.mxu0 %vm80_vm0, %v1102_v4  ;;  %v1091_v29 = vld [vmem:[%s1403_s4] ss:$0 sm:$0xff]  ;;  %vm1204_vm11 = vmmov 0  }
   0x6   :  { %1130 = vmatmul.mubr.msk.bf16.vlgmr.msra.gmra.mrb[0].mxu0 %vm80_vm0, %v1103_v8 }
   0x7   :  { %1133 = vmatprep.mubr.msk.bf16.mxu0 %vm80_vm0, %v1104_v9 }
   0xe   :  { %1134 = vmatmul.mubr.msk.bf16.gmra.mrb[4].mxu0 %vm80_vm0, %v1105_v12 }
  0xd9   :  { %v1131_v14 = vpop.f32.mrb[0].mxu0 }
  0xda   :  { %v136_v15 = vadd.f32 %v1131_v14, %v1081_v13  ;;  %v127_v16 = vpop.f32.mrb[1].mxu0 }
  0xdb   :  { %v128_v17 = vadd.f32 %v1081_v13, %v127_v16  ;;  %v1132_v18 = vpop.f32.mrb[2].mxu0 }
  0xdc   :  { %1181 = vtanh.f32 %v136_v15  ;;  %v139_v19 = vadd.f32 %v1132_v18, %v1081_v13  ;;  %v130_v20 = vpop.f32.mrb[3].mxu0 }
  0xdd   :  { %1183 = vtanh.f32 %v128_v17  ;;  %v131_v21 = vadd.f32 %v1081_v13, %v130_v20  ;;  %v206_v20 = vld [vmem:[%s1404_s1] sm:$0xff] }
  0xde   :  { %1185 = vtanh.f32 %v139_v19  ;;  %vm207_vm9 = vcmp.eq.f32.partialorder %v206_v20, 0.0 }
  0xdf   :  { %1187 = vtanh.f32 %v131_v21 }
  0xe1   :  { %v1135_v22 = vpop.f32.mrb[4].mxu0 }
  0xe2   :  { %v152_v23 = vadd.f32 %v1135_v22, %v1081_v13  ;;  %v143_v24 = vpop.f32.mrb[5].mxu0 }
  0xe3   :  { %v144_v25 = vadd.f32 %v1081_v13, %v143_v24  ;;  %v1136_v26 = vpop.f32.mrb[6].mxu0 }
  0xe4   :  { %1189 = vtanh.f32 %v152_v23  ;;  %v155_v27 = vadd.f32 %v1136_v26, %v1081_v13  ;;  %v146_v28 = vpop.f32.mrb[7].mxu0 }
  0xe5   :  { %1191 = vtanh.f32 %v144_v25  ;;  %v147_v30 = vadd.f32 %v1081_v13, %v146_v28 }
  0xe6   :  { %v1182_v31 = vpop.eup %1181  ;;  %1193 = vtanh.f32 %v155_v27 }
  0xe7   :  { %v1184_v32 = vpop.eup %1183  ;;  %1195 = vtanh.f32 %v147_v30  ;;  %v175_v33 = vmul.f32 %v1182_v31, %v1091_v29 }
  0xe8   :  { %v1186_v34 = vpop.eup %1185  ;;  %v173_v35 = vmul.f32 %v1184_v32, %v1091_v29 }
  0xe9   :  { %v1188_v36 = vpop.eup %1187  ;;  %v188_v37 = vsel %vm181_vm1, %v175_v33, 0.0  ;;  %v176_v38 = vmul.f32 %v1186_v34, %v1091_v29 }
  0xea   :  { %189 = vadd.xlane.f32.xlu1 %v188_v37  ;;  %v182_v39 = vsel %vm181_vm1, %v173_v35, 0.0  ;;  %v174_v40 = vmul.f32 %v1188_v36, %v1091_v29 }
  0xeb   :  { %183 = vadd.xlane.f32.xlu0 %v182_v39  ;;  %v191_v41 = vsel %vm181_vm1, %v176_v38, 0.0 }
  0xec   :  { %v185_v43 = vsel %vm181_vm1, %v174_v40, 0.0 }
  0xee   :  { %v1190_v42 = vpop.eup %1189  ;;  %192 = vadd.xlane.f32.xlu1 %v191_v41 }
  0xef   :  { %v1192_v44 = vpop.eup %1191  ;;  %186 = vadd.xlane.f32.xlu0 %v185_v43  ;;  %v179_v50 = vmul.f32 %v1190_v42, %v1091_v29 }
  0xf0   :  { %v1194_v45 = vpop.eup %1193  ;;  %v177_v46 = vmul.f32 %v1192_v44, %v1091_v29 }
  0xf1   :  { %v1196_v47 = vpop.eup %1195  ;;  %v180_v52 = vmul.f32 %v1194_v45, %v1091_v29  ;;  %v200_v53 = vsel %vm181_vm1, %v179_v50, 0.0 }
  0xf2   :  { %v194_v48 = vsel %vm181_vm1, %v177_v46, 0.0  ;;  %v178_v49 = vmul.f32 %v1196_v47, %v1091_v29  ;;  %v1203_v29 = vmov 0.0  }
  0xf3   :  { %195 = vadd.xlane.f32.xlu0 %v194_v48  ;;  %v203_v54 = vsel %vm181_vm1, %v180_v52, 0.0  ;;  %1071 = vst [vmem:[%s1405_s8] sm:$0xff] %v1203_v29  ;;  %1137 = vmatprep.subr.mxu1 %v1203_v29 }
  0xf4   :  { %v197_v51 = vsel %vm181_vm1, %v178_v49, 0.0  ;;  %1162 = vmatprep.subr.mxu0 %v1203_v29  ;;  %1138 = vmatpush3.msra.mxu1 %v1257_v1  ;;  %v1205_v1 = vmov 1966171168  }
  0xf5   :  { %198 = vadd.xlane.f32.xlu1 %v197_v51  ;;  %1163 = vmatpush3.msra.mxu0 %v1284_v7  ;;  %v281_v36 = vunpack.c.l.s4 %v1205_v1 }
  0xf6   :  { %1142 = vmatprep.subr.mxu1 %v1203_v29  ;;  %1172 = vmatprep.subr.mxu0 %v1203_v29 }
  0xf7   :  { %201 = vadd.xlane.f32.xlu0 %v200_v53  ;;  %1139 = vmatprep.mubr.msk.f32.mxu1 %vm1204_vm11, %v1203_v29  ;;  %v282_v7 = vunpack.c.0.s8 %v281_v36 }
  0xf8   :  { %1164 = vmatprep.mubr.msk.f32.mxu0 %vm1204_vm11, %v1203_v29 }
  0xf9   :  { %204 = vadd.xlane.f32.xlu1 %v203_v54  ;;  %v285_v37 = vsub.s32 %v282_v7, %v1320_v57 }
 0x177   :  { %v190_v58 = vpop.xlane.xlu1 %189 }
 0x178   :  { %v184_v59 = vpop.xlane.xlu0 %183  ;;  %v229_v4 = vrot.slane %v190_v58, %v220_v60 }
 0x179   :  { %v221_v63 = vrot.slane %v184_v59, %v220_v60 }
 0x17b   :  { %v193_v61 = vpop.xlane.xlu1 %192 }
 0x17c   :  { %v187_v62 = vpop.xlane.xlu0 %186  ;;  %v233_v8 = vrot.slane %v193_v61, %v220_v60 }
 0x17d   :  { %v225_v0 = vrot.slane %v187_v62, %v220_v60 }
 0x17f   :  { %v251_v9 = vsel %vm250_vm2, %v225_v0, %v221_v63 }
 0x180   :  { %v253_v12 = vsel %vm252_vm3, %v229_v4, %v251_v9  ;;  %v196_v13 = vpop.xlane.xlu0 %195 }
 0x181   :  { %v255_v14 = vsel %vm254_vm4, %v233_v8, %v253_v12  ;;  %v237_v15 = vrot.slane %v196_v13, %v220_v60 }
 0x182   :  { %v199_v16 = vpop.xlane.xlu1 %198 }
 0x183   :  { %v257_v17 = vsel %vm256_vm5, %v237_v15, %v255_v14  ;;  %v241_v18 = vrot.slane %v199_v16, %v220_v60 }
 0x184   :  { %v202_v19 = vpop.xlane.xlu0 %201 }
 0x185   :  { %v259_v21 = vsel %vm258_vm6, %v241_v18, %v257_v17  ;;  %v245_v22 = vrot.slane %v202_v19, %v220_v60 }
 0x186   :  { %v205_v23 = vpop.xlane.xlu1 %204 }
 0x187   :  { %v249_v24 = vrot.slane %v205_v23, %v220_v60  ;;  %v261_v25 = vsel %vm260_vm7, %v245_v22, %v259_v21 }
 0x189   :  { %v263_v26 = vsel %vm262_vm8, %v249_v24, %v261_v25 }
 0x18a   :  { %v265_v27 = vsel %vm207_vm9, -1e+09, %v263_v26 }
 0x18b   :  { %v267_v28 = vsel %vm266_vm10, %v265_v27, -inf }
 0x18c   :  { %268 = vmax.xlane.f32.xlu0 %v267_v28 }
 0x219   :  { %v269_v30 = vpop.xlane.xlu0 %268 }
 0x21a   :  { %v270_v31 = vsub.f32 %v265_v27, %v269_v30 }
 0x21c   :  { %v271_v32 = vmul.f32 1.442695, %v270_v31 }
 0x21e   :  { %1197 = vpow2.f32 %v271_v32 }
 0x228   :  { %v1198_v33 = vpop.eup %1197 }
 0x229   :  { %v273_v34 = vsel %vm266_vm10, %v1198_v33, 0.0 }
 0x22a   :  { %274 = vadd.xlane.f32.xlu1 %v273_v34 }
 0x2b7   :  { %v275_v35 = vpop.xlane.xlu1 %274 }
 0x2b8   :  { %1199 = vrcp.f32 %v275_v35 }
 0x2c2   :  { %v1200_v38 = vpop.eup %1199 }
 0x2c3   :  { %v277_v39 = vmul.f32 %v1200_v38, %v1198_v33 }
 0x2c5   :  { %v279_v40 = vcombine.high %v277_v39, %v277_v39  ;;  %1072 = vst.msk [vmem:[%s1405_s8] sm:$0xff] %vm266_vm10, %v277_v39  ;;  %v286_v41 = vrot.slane %v277_v39, %v285_v37 }
 0x2c7   :  { %v293_v42 = vrot.slane %v279_v40, %v285_v37  ;;  %v294_v43 = vcombine.high %v286_v41, %v286_v41  ;;  %v302_v44 = vrot.slane %v286_v41, %v285_v37 }
 0x2c9   :  { %1140 = vmatmul.mubr.msk.f32.vlgmr.msra.gmra.mrb[0].mxu1 %vm266_vm10, %v302_v44  ;;  %v295_v45 = vcombine.high %v293_v42, %v293_v42  ;;  %v316_v46 = vrot.slane %v294_v43, %v285_v37  ;;  %v324_v48 = vcombine.high %v302_v44, %v302_v44 }
 0x2ca   :  { %1143 = vmatpush3.msra.mxu1 %v1262_v2  ;;  %1144 = vmatprep.mubr.msk.f32.mxu1 %vm1204_vm11, %v1203_v29 }
 0x2cb   :  { %1147 = vmatprep.subr.mxu1 %v1203_v29  ;;  %v323_v47 = vrot.slane %v295_v45, %v285_v37  ;;  %v326_v2 = vcombine.high %v316_v46, %v316_v46 }
 0x2cd   :  { %1145 = vmatmul.mubr.msk.f32.vlgmr.msra.gmra.mrb[2].mxu1 %vm266_vm10, %v316_v46  ;;  %1165 = vmatmul.mubr.msk.f32.vlgmr.msra.gmra.mrb[8].mxu0 %vm266_vm10, %v323_v47  ;;  %v327_v49 = vcombine.high %v323_v47, %v323_v47 }
 0x2ce   :  { %1148 = vmatpush3.msra.mxu1 %v1267_v3  ;;  %1149 = vmatprep.mubr.msk.f32.mxu1 %vm1204_vm11, %v1203_v29  ;;  %v309_v3 = vrot.slane %v293_v42, %v285_v37 }
 0x2cf   :  { %1152 = vmatprep.subr.mxu1 %v1203_v29  ;;  %1173 = vmatpush3.msra.mxu0 %v1301_v11 }
 0x2d0   :  { %1174 = vmatprep.mubr.msk.f32.mxu0 %vm1204_vm11, %v1203_v29  ;;  %v325_v11 = vcombine.high %v309_v3, %v309_v3 }
 0x2d1   :  { %1150 = vmatmul.mubr.msk.f32.vlgmr.msra.gmra.mrb[4].mxu1 %vm266_vm10, %v324_v48  ;;  %1175 = vmatmul.mubr.msk.f32.vlgmr.msra.gmra.mrb[10].mxu0 %vm266_vm10, %v327_v49 }
 0x2d2   :  { %1153 = vmatpush3.msra.mxu1 %v1274_v5  ;;  %1154 = vmatprep.mubr.msk.f32.mxu1 %vm1204_vm11, %v1203_v29 }
 0x2d3   :  { %1157 = vmatprep.subr.mxu1 %v1203_v29 }
 0x2d5   :  { %1155 = vmatmul.mubr.msk.f32.vlgmr.msra.gmra.mrb[6].mxu1 %vm266_vm10, %v326_v2 }
 0x2d6   :  { %1158 = vmatpush3.msra.mxu1 %v1279_v6  ;;  %1159 = vmatprep.mubr.msk.f32.mxu1 %vm1204_vm11, %v1203_v29 }
 0x2d7   :  { %1167 = vmatprep.subr.mxu1 %v1203_v29 }
 0x2d9   :  { %1160 = vmatmul.mubr.msk.f32.vlgmr.msra.gmra.mrb[8].mxu1 %vm266_vm10, %v309_v3 }
 0x2da   :  { %1168 = vmatpush3.msra.mxu1 %v1296_v10  ;;  %1169 = vmatprep.mubr.msk.f32.mxu1 %vm1204_vm11, %v1203_v29 }
 0x2dd   :  { %1170 = vmatmul.mubr.msk.f32.vlgmr.msra.gmra.mrb[10].mxu1 %vm266_vm10, %v325_v11 }
 0x39c   :  { %v396_v5 = vpop.f32.mrb[0].mxu1 }
 0x39d   :  { %v1141_v50 = vpop.f32.mrb[1].mxu1 }
 0x3a0   :  { %v468_v51 = vpop.f32.mrb[2].mxu1  ;;  %v756_v52 = vpop.f32.mrb[8].mxu0 }
 0x3a1   :  { %v912_v53 = vrot.slane %v468_v51, 7  ;;  %v1146_v54 = vpop.f32.mrb[3].mxu1  ;;  %v1166_v6 = vpop.f32.mrb[9].mxu0  ;;  %v920_v12 = vrot.slane %v756_v52, 3 }
 0x3a3   :  { %v913_v55 = vsel %vm250_vm2, %v912_v53, %v396_v5 }
 0x3a4   :  { %v540_v56 = vpop.f32.mrb[4].mxu1  ;;  %v900_v57 = vpop.f32.mrb[10].mxu0 }
 0x3a5   :  { %v914_v58 = vrot.slane %v540_v56, 6  ;;  %v1151_v59 = vpop.f32.mrb[5].mxu1  ;;  %v1176_v60 = vpop.f32.mrb[11].mxu0  ;;  %v924_v18 = vrot.slane %v900_v57, 1 }
 0x3a6   :  { %v1100_v59 = vld [vmem:[%s1406_s5] ss:$0 sm:$0xff] }
 0x3a7   :  { %v915_v10 = vsel %vm252_vm3, %v914_v58, %v913_v55 }
 0x3a8   :  { %v612_v61 = vpop.f32.mrb[6].mxu1 }
 0x3a9   :  { %v916_v62 = vrot.slane %v612_v61, 5  ;;  %v1156_v63 = vpop.f32.mrb[7].mxu1 }
 0x3ab   :  { %v917_v0 = vsel %vm254_vm4, %v916_v62, %v915_v10 }
 0x3ac   :  { %v684_v4 = vpop.f32.mrb[8].mxu1 }
 0x3ad   :  { %v918_v8 = vrot.slane %v684_v4, 4  ;;  %v1161_v9 = vpop.f32.mrb[9].mxu1 }
 0x3af   :  { %v919_v13 = vsel %vm256_vm5, %v918_v8, %v917_v0 }
 0x3b0   :  { %v828_v14 = vpop.f32.mrb[10].mxu1  ;;  %v921_v15 = vsel %vm258_vm6, %v920_v12, %v919_v13 }
 0x3b1   :  { %v922_v16 = vrot.slane %v828_v14, 2  ;;  %v1171_v17 = vpop.f32.mrb[11].mxu1 }
 0x3b3   :  { %v923_v19 = vsel %vm260_vm7, %v922_v16, %v921_v15 }
 0x3b4   :  { %v925_v20 = vsel %vm262_vm8, %v924_v18, %v923_v19 }
 0x3b5   :  { %v927_v21 = vsel %vm80_vm0, %v925_v20, 0.0 }
 0x3b6   :  { %928 = vadd.xlane.f32.xlu0 %v927_v21 }
 0x443   :  { %v929_v22 = vpop.xlane.xlu0 %928 }
 0x444   :  { %v931_v23 = vmul.f32 0.0625, %v929_v22 }
 0x446   :  { %v933_v24 = vrot.slane %v931_v23, 1  ;;  %v934_v25 = vrot.slane %v931_v23, 2  ;;  %v935_v26 = vrot.slane %v931_v23, 3  ;;  %v936_v27 = vrot.slane %v931_v23, 4 }
 0x447   :  { %v937_v28 = vrot.slane %v931_v23, 5  ;;  %v938_v29 = vrot.slane %v931_v23, 6  ;;  %v939_v30 = vrot.slane %v931_v23, 7  ;;  %v948_v31 = vsub.f32 %v396_v5, %v931_v23  ;;  %v1101_v23 = vld [vmem:[%s1407_s6] ss:$0 sm:$0xff] }
 0x448   :  { %v949_v32 = vsub.f32 %v468_v51, %v933_v24  ;;  %v950_v33 = vsub.f32 %v540_v56, %v934_v25  ;;  %v951_v34 = vsub.f32 %v612_v61, %v935_v26  ;;  %v952_v35 = vsub.f32 %v684_v4, %v936_v27 }
 0x449   :  { %v953_v1 = vsub.f32 %v756_v52, %v937_v28  ;;  %v954_v36 = vsub.f32 %v828_v14, %v938_v29  ;;  %v955_v7 = vsub.f32 %v900_v57, %v939_v30  ;;  %v956_v41 = vmul.f32 %v948_v31, %v948_v31 }
 0x44a   :  { %v957_v37 = vmul.f32 %v949_v32, %v949_v32  ;;  %v958_v38 = vmul.f32 %v950_v33, %v950_v33  ;;  %v959_v39 = vmul.f32 %v951_v34, %v951_v34  ;;  %v960_v40 = vmul.f32 %v952_v35, %v952_v35 }
 0x44b   :  { %v961_v42 = vmul.f32 %v953_v1, %v953_v1  ;;  %v962_v45 = vmul.f32 %v954_v36, %v954_v36  ;;  %v963_v46 = vmul.f32 %v955_v7, %v955_v7 }
 0x44c   :  { %v972_v43 = vrot.slane %v957_v37, 7  ;;  %v974_v44 = vrot.slane %v958_v38, 6  ;;  %v976_v48 = vrot.slane %v959_v39, 5  ;;  %v978_v2 = vrot.slane %v960_v40, 4 }
 0x44d   :  { %v980_v11 = vrot.slane %v961_v42, 3  ;;  %v982_v50 = vrot.slane %v962_v45, 2  ;;  %v984_v52 = vrot.slane %v963_v46, 1 }
 0x44e   :  { %v973_v47 = vsel %vm250_vm2, %v972_v43, %v956_v41 }
 0x44f   :  { %v975_v49 = vsel %vm252_vm3, %v974_v44, %v973_v47 }
 0x450   :  { %v977_v3 = vsel %vm254_vm4, %v976_v48, %v975_v49 }
 0x451   :  { %v979_v5 = vsel %vm256_vm5, %v978_v2, %v977_v3 }
 0x452   :  { %v981_v51 = vsel %vm258_vm6, %v980_v11, %v979_v5 }
 0x453   :  { %v983_v53 = vsel %vm260_vm7, %v982_v50, %v981_v51 }
 0x454   :  { %v985_v54 = vsel %vm262_vm8, %v984_v52, %v983_v53 }
 0x455   :  { %v987_v6 = vsel %vm80_vm0, %v985_v54, 0.0 }
 0x456   :  { %988 = vadd.xlane.f32.xlu1 %v987_v6 }
 0x4e3   :  { %v989_v55 = vpop.xlane.xlu1 %988 }
 0x4e4   :  { %v990_v56 = vmul.f32 0.0625, %v989_v55 }
 0x4e6   :  { %v991_v57 = vadd.f32 1e-05, %v990_v56 }
 0x4e8   :  { %1201 = vrsqrt.f32 %v991_v57 }
 0x4f2   :  { %v1202_v58 = vpop.eup %1201 }
 0x4f3   :  { %v994_v60 = vrot.slane %v1202_v58, 1  ;;  %v995_v10 = vrot.slane %v1202_v58, 2  ;;  %v996_v61 = vrot.slane %v1202_v58, 3  ;;  %v997_v62 = vrot.slane %v1202_v58, 4 }
 0x4f4   :  { %v998_v63 = vrot.slane %v1202_v58, 5  ;;  %v999_v0 = vrot.slane %v1202_v58, 6  ;;  %v1000_v4 = vrot.slane %v1202_v58, 7  ;;  %v1009_v8 = vmul.f32 %v1202_v58, %v948_v31 }
 0x4f5   :  { %v1010_v9 = vmul.f32 %v994_v60, %v949_v32  ;;  %v1011_v12 = vmul.f32 %v995_v10, %v950_v33  ;;  %v1012_v13 = vmul.f32 %v996_v61, %v951_v34  ;;  %v1013_v14 = vmul.f32 %v997_v62, %v952_v35 }
 0x4f6   :  { %v1014_v15 = vmul.f32 %v998_v63, %v953_v1  ;;  %v1015_v16 = vmul.f32 %v999_v0, %v954_v36  ;;  %v1016_v17 = vmul.f32 %v1000_v4, %v955_v7  ;;  %v1024_v18 = vmul.f32 %v1100_v59, %v1009_v8 }
 0x4f7   :  { %v1025_v19 = vmul.f32 %v1100_v59, %v1010_v9  ;;  %v1026_v20 = vmul.f32 %v1100_v59, %v1011_v12  ;;  %v1027_v21 = vmul.f32 %v1100_v59, %v1012_v13  ;;  %v1028_v22 = vmul.f32 %v1100_v59, %v1013_v14 }
 0x4f8   :  { %v1029_v24 = vmul.f32 %v1100_v59, %v1014_v15  ;;  %v1030_v25 = vmul.f32 %v1100_v59, %v1015_v16  ;;  %v1031_v26 = vmul.f32 %v1100_v59, %v1016_v17  ;;  %v1039_v31 = vadd.f32 %v1101_v23, %v1024_v18 }
 0x4f9   :  { %v1040_v27 = vadd.f32 %v1101_v23, %v1025_v19  ;;  %v1041_v28 = vadd.f32 %v1101_v23, %v1026_v20  ;;  %v1042_v29 = vadd.f32 %v1101_v23, %v1027_v21  ;;  %v1043_v30 = vadd.f32 %v1101_v23, %v1028_v22 }
 0x4fa   :  { %v1044_v32 = vadd.f32 %v1101_v23, %v1029_v24  ;;  %v1045_v35 = vadd.f32 %v1101_v23, %v1030_v25  ;;  %v1046_v1 = vadd.f32 %v1101_v23, %v1031_v26 }
 0x4fb   :  { %v1055_v33 = vrot.slane %v1040_v27, 7  ;;  %v1057_v34 = vrot.slane %v1041_v28, 6  ;;  %v1059_v7 = vrot.slane %v1042_v29, 5  ;;  %v1061_v38 = vrot.slane %v1043_v30, 4 }
 0x4fc   :  { %v1063_v40 = vrot.slane %v1044_v32, 3  ;;  %v1065_v42 = vrot.slane %v1045_v35, 2  ;;  %v1067_v44 = vrot.slane %v1046_v1, 1 }
 0x4fd   :  { %v1056_v36 = vsel %vm250_vm2, %v1055_v33, %v1039_v31 }
 0x4fe   :  { %v1058_v37 = vsel %vm252_vm3, %v1057_v34, %v1056_v36 }
 0x4ff   :  { %v1060_v39 = vsel %vm254_vm4, %v1059_v7, %v1058_v37 }
 0x500   :  { %v1062_v41 = vsel %vm256_vm5, %v1061_v38, %v1060_v39 }
 0x501   :  { %v1064_v43 = vsel %vm258_vm6, %v1063_v40, %v1062_v41 }
 0x502   :  { %v1066_v45 = vsel %vm260_vm7, %v1065_v42, %v1064_v43 }
 0x503   :  { %v1068_v46 = vsel %vm262_vm8, %v1067_v44, %v1066_v45 }
 0x504   :  { %1070 = vst.msk [vmem:[%s1408_s7] sm:$0xff] %vm80_vm0, %v1068_v46 }

</bundles_post_ra>
